<compile_context>
chip_gen: v5e
topology: v5e:2x2
jax: 0.10.0
libtpu: 0.0.40
codegen_flags: <defaults>
</compile_context>

<pallas_src>
import functools
import math

import jax
import jax.numpy as jnp
from jax import lax
from jax.experimental import pallas as pl
from jax.experimental.pallas import tpu as pltpu


# ---------------------------------------------------------------------------
# Kernel
# ---------------------------------------------------------------------------
def _conv_kernel(x_ref, w_ref, o_ref, *, K, dilation, Ho_k, mxu_dtype):
    """K chained lane-dense MXU matmuls.

    x_ref : (Bb, Hp, Wp*Cin)          merged, lane-dense padded input block
    w_ref : (K, Wp*Cin, Wo*Cout)      banded (Toeplitz) weights, one slab per ki
    o_ref : (Bb*Ho_k, Wo*Cout)        lane-dense output block (H at stride 1)
    """
    Bb, _, WpC = x_ref.shape
    rows = Bb * Ho_k

    acc = None
    for ki in range(K):                         # unrolled: K is small & static
        r0 = ki * dilation                      # contiguous H (sublane) slice only
        xk = x_ref[:, r0:r0 + Ho_k, :].reshape(rows, WpC)
        if mxu_dtype is not None:               # bf16 operands on v6e/v7x, f32 accumulation
            xk = xk.astype(mxu_dtype)
        part = jnp.dot(xk, w_ref[ki], preferred_element_type=jnp.float32)
        acc = part if acc is None else acc + part   # stays in vregs / MRB (no VMEM RMW)
    o_ref[...] = acc.astype(o_ref.dtype)


# ---------------------------------------------------------------------------
# Wrapper helpers
# ---------------------------------------------------------------------------
def _banded_weight(weight, Wp, Wo, K, stride, dilation, dtype):
    """Build Wband[ki][(wp*Cin+ci), (wo*Cout+co)] = w[co,ci,ki,kj] if wp == wo*stride + kj*dil."""
    Cout, Cin = weight.shape[0], weight.shape[1]
    wp = jnp.arange(Wp)
    wo = jnp.arange(Wo)
    diff = wp[:, None] - wo[None, :] * stride                    # (Wp, Wo)
    kj = diff // dilation
    valid = (diff >= 0) & (diff % dilation == 0) & (kj < K)
    kj_safe = jnp.clip(kj, 0, K - 1)
    w_perm = jnp.transpose(weight, (3, 1, 2, 0))                 # (Kj, Cin, Ki, Cout)
    sel = w_perm[kj_safe]                                        # (Wp, Wo, Cin, Ki, Cout)
    sel = jnp.where(valid[:, :, None, None, None], sel,
                    jnp.zeros((), sel.dtype))
    banded = jnp.transpose(sel, (3, 0, 2, 1, 4))                 # (Ki, Wp, Cin, Wo, Cout)
    return banded.reshape(K, Wp * Cin, Wo * Cout).astype(dtype)


def _pick_block_b(B, Ho_k, x_img_bytes, out_img_bytes, w_bytes, budget_bytes=24 << 20):
    """Largest batch block fitting the VMEM budget, with >=2 grid steps and 8-row alignment."""
    per_img = 2 * (x_img_bytes + out_img_bytes)          # double-buffered in/out blocks
    avail = max(budget_bytes - 2 * w_bytes, per_img)
    bb = max(1, min(B, int(avail // per_img)))
    if B >= 2:
        bb = min(bb, max(1, B // 2))                     # >=2 steps -> v7x 2nd TC has work
    if Ho_k % 8 != 0:                                    # out-block sublane (8) alignment
        m = 8 // math.gcd(Ho_k, 8)
        bb = max(m, (bb // m) * m)
    return bb


# ---------------------------------------------------------------------------
# Forward
# ---------------------------------------------------------------------------
def conv3x3_forward(x, weight, *, kernel_size=3, stride=1, dilation=1,
                    mxu_dtype=None, block_b=None, vmem_budget_bytes=24 << 20):
    """Conv3x3.forward: reflection-pad then conv2d (no bias).

    x      : (B, Cin, H, W)   NCHW
    weight : (Cout, Cin, K, K)
    mxu_dtype : e.g. jnp.bfloat16 on v6e/v7x for ~2-3x MXU throughput (f32 accumulation kept).
    returns: (B, Cout, Ho, Wo) NCHW
    """
    B, Cin, H, W = x.shape
    Cout = weight.shape[0]
    K = kernel_size
    assert weight.shape == (Cout, Cin, K, K)
    # NOTE: matches torch int(dilation*(K-1)/2); only "same"-style for odd K.
    pad = (dilation * (K - 1)) // 2
    # NOTE: reflect padding (like ReflectionPad2d) requires pad < H and pad < W.

    # ---- wrapper-side layout plumbing (fused by XLA into one HBM copy pass) ----
    x_nhwc = jnp.transpose(x, (0, 2, 3, 1))
    x_pad = jnp.pad(x_nhwc, ((0, 0), (pad, pad), (pad, pad), (0, 0)), mode="reflect")
    Hp, Wp = H + 2 * pad, W + 2 * pad
    Ho = (Hp - dilation * (K - 1) - 1) // stride + 1
    Wo = (Wp - dilation * (K - 1) - 1) // stride + 1
    Ho_k = Hp - dilation * (K - 1)            # kernel computes H rows at stride 1
    WpC = Wp * Cin
    N = Wo * Cout
    x_m = x_pad.reshape(B, Hp, WpC)           # merged lane-dense minor dim

    w_dtype = mxu_dtype if mxu_dtype is not None else x.dtype
    w_banded = _banded_weight(weight, Wp, Wo, K, stride, dilation, w_dtype)

    # ---- block / grid selection under a real VMEM budget ----
    itemsize = jnp.dtype(x.dtype).itemsize
    x_img_bytes = Hp * WpC * itemsize
    out_img_bytes = Ho_k * N * itemsize
    w_bytes = int(w_banded.size) * jnp.dtype(w_dtype).itemsize
    if block_b is None:
        block_b = _pick_block_b(B, Ho_k, x_img_bytes, out_img_bytes, w_bytes,
                                budget_bytes=vmem_budget_bytes)
    num_blocks = pl.cdiv(B, block_b)
    B_pad = num_blocks * block_b
    if B_pad != B:                            # pad batch instead of shrinking block_b
        x_m = jnp.pad(x_m, ((0, B_pad - B), (0, 0), (0, 0)))
    grid = (num_blocks,)

    need = 2 * block_b * (x_img_bytes + out_img_bytes) + 2 * w_bytes + (1 << 20)
    # Cap below v7x's 64 MiB physical VMEM; v5e/v6e have 128 MiB so this is always safe.
    vmem_limit = int(min(max(need, 32 << 20), 48 << 20))

    kernel = functools.partial(_conv_kernel, K=K, dilation=dilation,
                               Ho_k=Ho_k, mxu_dtype=mxu_dtype)
    out_m = pl.pallas_call(
        kernel,
        out_shape=jax.ShapeDtypeStruct((B_pad * Ho_k, N), x.dtype),
        grid_spec=pltpu.PrefetchScalarGridSpec(
            num_scalar_prefetch=0,
            grid=grid,
            in_specs=[
                pl.BlockSpec((block_b, Hp, WpC), lambda b: (b, 0, 0)),
                pl.BlockSpec((K, WpC, N), lambda b: (0, 0, 0)),
            ],
            out_specs=pl.BlockSpec((block_b * Ho_k, N), lambda b: (b, 0)),
        ),
        compiler_params=pltpu.CompilerParams(
            dimension_semantics=("parallel",),
            vmem_limit_bytes=vmem_limit,
        ),
    )(x_m, w_banded)

    # ---- wrapper-side un-plumbing: drop batch pad, decimate H for stride>1, back to NCHW ----
    out = out_m.reshape(B_pad, Ho_k, Wo, Cout)[:B]
    if stride > 1:
        out = out[:, ::stride]
    out = out[:, :Ho]
    return jnp.transpose(out, (0, 3, 1, 2))


# ---------------------------------------------------------------------------
# Pure-JAX reference (mirrors the PyTorch forward exactly) for verification.
# ---------------------------------------------------------------------------
def conv3x3_ref(x, weight, *, kernel_size=3, stride=1, dilation=1):
    K = kernel_size
    pad = (dilation * (K - 1)) // 2
    x_pad = jnp.pad(x, ((0, 0), (0, 0), (pad, pad), (pad, pad)), mode="reflect")
    return lax.conv_general_dilated(
        x_pad, weight,
        window_strides=(stride, stride),
        padding="VALID",
        rhs_dilation=(dilation, dilation),
        dimension_numbers=("NCHW", "OIHW", "NCHW"),
    )


if __name__ == "__main__":
    B, Cin, H, W = 2, 8, 16, 16
    Cout, K = 16, 3

    key = jax.random.PRNGKey(0)
    kx, kw = jax.random.split(key)
    x = jax.random.normal(kx, (B, Cin, H, W), dtype=jnp.float32)
    weight = jax.random.normal(kw, (Cout, Cin, K, K), dtype=jnp.float32) * 0.1

    # f32 path: dilation=1, dilation=2, and (previously untested) stride=2.
    for (s, d) in [(1, 1), (1, 2), (2, 1)]:
        fwd = jax.jit(functools.partial(conv3x3_forward,
                                        kernel_size=K, stride=s, dilation=d))
        out = jax.block_until_ready(fwd(x, weight))
        ref = conv3x3_ref(x, weight, kernel_size=K, stride=s, dilation=d)
        assert out.shape == ref.shape and out.dtype == x.dtype
        assert jnp.allclose(out, ref, atol=3e-4, rtol=3e-4), f"mismatch stride={s} dil={d}"

    # bf16 MXU-operand path (v6e/v7x advice): f32 accumulation, loose tolerance.
    fwd_bf16 = jax.jit(functools.partial(conv3x3_forward, kernel_size=K,
                                         stride=1, dilation=1,
                                         mxu_dtype=jnp.bfloat16))
    out_b = jax.block_until_ready(fwd_bf16(x, weight))
    ref_b = conv3x3_ref(x, weight, kernel_size=K, stride=1, dilation=1)
    assert jnp.allclose(out_b, ref_b, atol=1e-1, rtol=1e-1), "mismatch (bf16 MXU path)"

    print("KERNEL_OK")
</pallas_src>

<mosaic_0001>
module attributes {stable_mosaic.version = 11 : i64} {
  func.func @_conv_kernel(%arg0: i32, %arg1: memref<1x18x144xf32, #tpu.memory_space<vmem>>, %arg2: memref<3x144x256xf32, #tpu.memory_space<vmem>>, %arg3: memref<16x256xf32, #tpu.memory_space<vmem>>) attributes {dimension_semantics = [#tpu.dimension_semantics<parallel>], iteration_bounds = array<i64: 2>, scalar_prefetch = 0 : i64, scratch_operands = 0 : i64, tpu.core_type = #tpu.core_type<tc>, window_params = [{transform_indices = @transform_0, window_bounds = array<i64: 1, 18, 144>}, {pipeline_mode = #tpu.pipeline_mode<synchronous>, transform_indices = @transform_1, window_bounds = array<i64: 3, 144, 256>}, {transform_indices = @transform_2, window_bounds = array<i64: 16, 256>}]} {
    %c0 = arith.constant 0 : index
    %c0_0 = arith.constant 0 : index
    %c0_1 = arith.constant 0 : index
    %0 = vector.load %arg1[%c0, %c0_0, %c0_1] : memref<1x18x144xf32, #tpu.memory_space<vmem>>, vector<1x16x144xf32>
    %1 = vector.shape_cast %0 : vector<1x16x144xf32> to vector<16x144xf32>
    %c0_2 = arith.constant 0 : index
    %c0_3 = arith.constant 0 : index
    %c0_4 = arith.constant 0 : index
    %2 = vector.load %arg2[%c0_2, %c0_3, %c0_4] : memref<3x144x256xf32, #tpu.memory_space<vmem>>, vector<1x144x256xf32>
    %3 = vector.shape_cast %2 : vector<1x144x256xf32> to vector<144x256xf32>
    %cst = arith.constant dense<0.000000e+00> : vector<16x256xf32>
    %4 = tpu.matmul %1, %3, %cst {dimension_numbers = #tpu.dot_dimension_numbers<[1], [0], [0], [1], [0, 0, 1, 1], [], []>} : vector<16x144xf32>, vector<144x256xf32>, vector<16x256xf32> -> vector<16x256xf32>
    %c0_5 = arith.constant 0 : index
    %c1 = arith.constant 1 : index
    %c0_6 = arith.constant 0 : index
    %5 = vector.load %arg1[%c0_5, %c1, %c0_6] : memref<1x18x144xf32, #tpu.memory_space<vmem>>, vector<1x16x144xf32>
    %6 = vector.shape_cast %5 : vector<1x16x144xf32> to vector<16x144xf32>
    %c1_7 = arith.constant 1 : index
    %c0_8 = arith.constant 0 : index
    %c0_9 = arith.constant 0 : index
    %7 = vector.load %arg2[%c1_7, %c0_8, %c0_9] : memref<3x144x256xf32, #tpu.memory_space<vmem>>, vector<1x144x256xf32>
    %8 = vector.shape_cast %7 : vector<1x144x256xf32> to vector<144x256xf32>
    %cst_10 = arith.constant dense<0.000000e+00> : vector<16x256xf32>
    %9 = tpu.matmul %6, %8, %cst_10 {dimension_numbers = #tpu.dot_dimension_numbers<[1], [0], [0], [1], [0, 0, 1, 1], [], []>} : vector<16x144xf32>, vector<144x256xf32>, vector<16x256xf32> -> vector<16x256xf32>
    %10 = arith.addf %4, %9 : vector<16x256xf32>
    %c0_11 = arith.constant 0 : index
    %c2 = arith.constant 2 : index
    %c0_12 = arith.constant 0 : index
    %11 = vector.load %arg1[%c0_11, %c2, %c0_12] : memref<1x18x144xf32, #tpu.memory_space<vmem>>, vector<1x16x144xf32>
    %12 = vector.shape_cast %11 : vector<1x16x144xf32> to vector<16x144xf32>
    %c2_13 = arith.constant 2 : index
    %c0_14 = arith.constant 0 : index
    %c0_15 = arith.constant 0 : index
    %13 = vector.load %arg2[%c2_13, %c0_14, %c0_15] : memref<3x144x256xf32, #tpu.memory_space<vmem>>, vector<1x144x256xf32>
    %14 = vector.shape_cast %13 : vector<1x144x256xf32> to vector<144x256xf32>
    %cst_16 = arith.constant dense<0.000000e+00> : vector<16x256xf32>
    %15 = tpu.matmul %12, %14, %cst_16 {dimension_numbers = #tpu.dot_dimension_numbers<[1], [0], [0], [1], [0, 0, 1, 1], [], []>} : vector<16x144xf32>, vector<144x256xf32>, vector<16x256xf32> -> vector<16x256xf32>
    %16 = arith.addf %10, %15 : vector<16x256xf32>
    %c0_17 = arith.constant 0 : index
    %c0_18 = arith.constant 0 : index
    %17 = vector.load %arg3[%c0_17, %c0_18] : memref<16x256xf32, #tpu.memory_space<vmem>>, vector<16x256xf32>
    tpu.vector_store %arg3[%c0_17, %c0_18], %16 {strides = array<i32>} : memref<16x256xf32, #tpu.memory_space<vmem>>, vector<16x256xf32>,
    return
  }
  func.func @transform_0(%arg0: i32) -> (i32, i32, i32) {
    %c0_i32 = arith.constant 0 : i32
    %c0_i32_0 = arith.constant 0 : i32
    %c0_i32_1 = arith.constant 0 : i32
    return %arg0, %c0_i32, %c0_i32_0 : i32, i32, i32
  }
  func.func @transform_1(%arg0: i32) -> (i32, i32, i32) {
    %c0_i32 = arith.constant 0 : i32
    %c0_i32_0 = arith.constant 0 : i32
    %c0_i32_1 = arith.constant 0 : i32
    %c0_i32_2 = arith.constant 0 : i32
    return %c0_i32, %c0_i32_0, %c0_i32_1 : i32, i32, i32
  }
  func.func @transform_2(%arg0: i32) -> (i32, i32) {
    %c0_i32 = arith.constant 0 : i32
    %c0_i32_0 = arith.constant 0 : i32
    return %arg0, %c0_i32 : i32, i32
  }
}

</mosaic_0001>

<bundles_post_ra>
// kernel: conv3x3_forward.1
= control target key start
LH: loop header
LB: loop body
LE: loop exit
PB: predicated region body
PF: predicated region fallthrough
CT: control target
= control target key end

     0   :  { %s789_s9 = smov 0   ;;  %s1185_s0 = inlined_call_operand.vmem [shape: f32[2,18,144], index: 0, kind: input, shape index: {}]   ;;  %s1186_s1 = inlined_call_operand.vmem [shape: f32[3,144,256], index: 1, kind: input, shape index: {}]   ;;  %s1187_s2 = inlined_call_operand.vmem [shape: f32[32,256], index: 2, kind: output, shape index: {}]  }
   0x1 LB: > { %s795_s10 = sadd.s32 4294967295, %s772_s9   ;;  %p665_p0 = scmp.ge.s32.totalorder %s772_s9, 1  ;;  %s772_s9 = sphi %s789_s9, %s12_s9  }
   0x2   : > { %p112_p1 = scmp.lt.s32.totalorder %s772_s9, 3 }
   0x4   : > { %p113_p2 = pnand %p665_p0, %p112_p1 }
   0x5   : > { %p135_p3 = scmp.lt.s32.totalorder (!%p113_p2), %s795_s10, 1 }
   0x6   : > { %116 = sbr.rel (%p113_p2) target bundleno = 224 (0xe0), region = 28 }
   0xb   : > { %v700_v0 = vld [vmem:[%s1186_s1 + $0x210] sm:$0xff]  ;;  %v701_v2 = vld [vmem:[%s1186_s1 + $0x218] sm:$0xff]  ;;  %v698_v3 = vld [vmem:[%s1186_s1 + $0x200] sm:$0xff]  ;;  %s136_s27 = scalar_select %p135_p3, %s795_s10, 1  ;;  %vm234_vm0 = vcmask 1046528   ;;  %vm247_vm1 = vcmask 130048  }
   0xc   : > { %v704_v1 = vld [vmem:[%s1186_s1 + $0x230] sm:$0xff]  ;;  %252 = vmatpush.msra.mxu0 %v700_v0  ;;  %v702_v4 = vld [vmem:[%s1186_s1 + $0x220] sm:$0xff]  ;;  %v699_v5 = vld [vmem:[%s1186_s1 + $0x208] sm:$0xff]  ;;  %298 = vmatpush.msra.mxu2 %v701_v2  ;;  %vm486_vm2 = vcmask 1045504  }
   0xd   : > { %289 = vmatpush.msra.mxu1 %v704_v1  ;;  %v181_v6 = vld [vmem:[%s1186_s1 + $0xf0] sm:$0xff]  ;;  %v697_v8 = vld [vmem:[%s1186_s1 + $0x1f8] sm:$0xff]  ;;  %v179_v10 = vld [vmem:[%s1186_s1 + $0xe0] sm:$0xff]  ;;  %s757_s12 = smul.u32 48, %s136_s27 }
   0xe   : > { %v696_v7 = vld [vmem:[%s1186_s1 + $0x1f0] sm:$0xff]  ;;  %253 = vmatpush.msra.mxu0 %v698_v3  ;;  %v705_v9 = vld [vmem:[%s1186_s1 + $0x238] sm:$0xff]  ;;  %299 = vmatpush.msra.mxu2 %v699_v5  ;;  %v694_v11 = vld [vmem:[%s1186_s1 + $0x1e0] sm:$0xff] }
   0xf   : > { %290 = vmatpush.msra.mxu1 %v702_v4  ;;  %v703_v12 = vld [vmem:[%s1186_s1 + $0x228] sm:$0xff]  ;;  %335 = vmatpush.msra.mxu3 %v705_v9  ;;  %v177_v14 = vld [vmem:[%s1186_s1 + $0xd0] sm:$0xff]  ;;  %v693_v16 = vld [vmem:[%s1186_s1 + $0x1d8] sm:$0xff]  ;;  %s858_s25 = scalar_lea.vmem %s1185_s0, %s757_s12 }
  0x10   : > { %254 = vmatpush.msra.mxu0 %v696_v7  ;;  %v695_v13 = vld [vmem:[%s1186_s1 + $0x1e8] sm:$0xff]  ;;  %300 = vmatpush.msra.mxu2 %v697_v8  ;;  %v692_v15 = vld [vmem:[%s1186_s1 + $0x1d0] sm:$0xff]  ;;  %v175_v18 = vld [vmem:[%s1186_s1 + $0xc0] sm:$0xff] }
  0x11   : > { %349 = vmatpush.msrb.mxu1 %v181_v6  ;;  %v185_v17 = vld [vmem:[%s1186_s1 + $0x110] sm:$0xff]  ;;  %336 = vmatpush.msra.mxu3 %v703_v12  ;;  %v864_v19 = vld [vmem:[%s858_s25 + $0x18] sm:$0xff]  ;;  %v188_v20 = vld [vmem:[%s858_s25 + $0x8] sm:$0xfe] }
  0x12   : > { %255 = vmatpush.msra.mxu0 %v694_v11  ;;  %301 = vmatpush.msra.mxu2 %v695_v13  ;;  %v690_v21 = vld [vmem:[%s1186_s1 + $0x1c0] sm:$0xff]  ;;  %v238_v22 = vrot.slane %v188_v20, 1  ;;  %v239_v23 = vrot.slane %v864_v19, 1  ;;  %v691_v24 = vld [vmem:[%s1186_s1 + $0x1c8] sm:$0xff]  ;;  %v173_v27 = vld [vmem:[%s1186_s1 + $0xb0] sm:$0xff] }
  0x13   : > { %350 = vmatpush.msrb.mxu1 %v179_v10  ;;  %386 = vmatpush.msrb.mxu3 %v185_v17  ;;  %v183_v25 = vld [vmem:[%s1186_s1 + $0x100] sm:$0xff]  ;;  %v182_v28 = vld [vmem:[%s1186_s1 + $0xf8] sm:$0xff]  ;;  %v688_v29 = vld [vmem:[%s1186_s1 + $0x1b0] sm:$0xff] }
  0x14   : > { %256 = vmatpush.msra.mxu0 %v692_v15  ;;  %302 = vmatpush.msra.mxu2 %v693_v16  ;;  %v240_v26 = vsel %vm234_vm0, %v238_v22, %v239_v23  ;;  %v689_v30 = vld [vmem:[%s1186_s1 + $0x1b8] sm:$0xff]  ;;  %v171_v31 = vld [vmem:[%s1186_s1 + $0xa0] sm:$0xff]  ;;  %v180_v32 = vld [vmem:[%s1186_s1 + $0xe8] sm:$0xff] }
  0x15   : > { %351 = vmatpush.msrb.mxu1 %v177_v14  ;;  %708 = vmatmul.msk.f32.vlgmr.msra.gmra.mxu3 %vm247_vm1, %v240_v26  ;;  %v686_v33 = vld [vmem:[%s1186_s1 + $0x1a0] sm:$0xff]  ;;  %v687_v34 = vld [vmem:[%s1186_s1 + $0x1a8] sm:$0xff]  ;;  %v169_v36 = vld [vmem:[%s1186_s1 + $0x90] sm:$0xff] }
  0x16   : > { %257 = vmatpush.msra.mxu0 %v690_v21  ;;  %303 = vmatpush.msra.mxu2 %v691_v24  ;;  %v190_v35 = vld [vmem:[%s858_s25 + $0x28] sm:$0x1]  ;;  %v178_v37 = vld [vmem:[%s1186_s1 + $0xd8] sm:$0xff]  ;;  %v684_v39 = vld [vmem:[%s1186_s1 + $0x190] sm:$0xff] }
  0x17   : > { %352 = vmatpush.msrb.mxu1 %v175_v18  ;;  %387 = vmatpush.msrb.mxu3 %v183_v25  ;;  %v243_v38 = vrot.slane %v190_v35, 1  ;;  %v685_v40 = vld [vmem:[%s1186_s1 + $0x198] sm:$0xff]  ;;  %v167_v41 = vld [vmem:[%s1186_s1 + $0x80] sm:$0xff]  ;;  %v176_v42 = vld [vmem:[%s1186_s1 + $0xc8] sm:$0xff] }
  0x18   : > { %258 = vmatpush.msra.mxu0 %v688_v29  ;;  %304 = vmatpush.msra.mxu2 %v689_v30  ;;  %v682_v43 = vld [vmem:[%s1186_s1 + $0x180] sm:$0xff]  ;;  %v683_v44 = vld [vmem:[%s1186_s1 + $0x188] sm:$0xff]  ;;  %v165_v46 = vld [vmem:[%s1186_s1 + $0x70] sm:$0xff] }
  0x19   : > { %353 = vmatpush.msrb.mxu1 %v173_v27  ;;  %395 = vmatpush.msra.mxu3 %v182_v28  ;;  %v244_v45 = vsel %vm234_vm0, %v239_v23, %v243_v38  ;;  %v174_v47 = vld [vmem:[%s1186_s1 + $0xb8] sm:$0xff]  ;;  %v680_v48 = vld [vmem:[%s1186_s1 + $0x170] sm:$0xff]  ;;  %v163_v50 = vld [vmem:[%s1186_s1 + $0x60] sm:$0xff] }
  0x1a   : > { %259 = vmatpush.msra.mxu0 %v686_v33  ;;  %305 = vmatpush.msra.mxu2 %v687_v34  ;;  %v681_v49 = vld [vmem:[%s1186_s1 + $0x178] sm:$0xff]  ;;  %v172_v51 = vld [vmem:[%s1186_s1 + $0xa8] sm:$0xff]  ;;  %v678_v52 = vld [vmem:[%s1186_s1 + $0x160] sm:$0xff] }
  0x1b   : > { %354 = vmatpush.msrb.mxu1 %v171_v31  ;;  %396 = vmatpush.msra.mxu3 %v180_v32  ;;  %v679_v53 = vld [vmem:[%s1186_s1 + $0x168] sm:$0xff]  ;;  %v161_v54 = vld [vmem:[%s1186_s1 + $0x50] sm:$0xff]  ;;  %v170_v55 = vld [vmem:[%s1186_s1 + $0x98] sm:$0xff] }
  0x1c   : > { %260 = vmatpush.msra.mxu0 %v684_v39  ;;  %306 = vmatpush.msra.mxu2 %v685_v40  ;;  %v676_v56 = vld [vmem:[%s1186_s1 + $0x150] sm:$0xff]  ;;  %v677_v57 = vld [vmem:[%s1186_s1 + $0x158] sm:$0xff]  ;;  %v159_v58 = vld [vmem:[%s1186_s1 + $0x40] sm:$0xff] }
  0x1d   : > { %355 = vmatpush.msrb.mxu1 %v169_v36  ;;  %397 = vmatpush.msra.mxu3 %v178_v37  ;;  %v168_v59 = vld [vmem:[%s1186_s1 + $0x88] sm:$0xff]  ;;  %v974_v60 = vld [vmem:[%s858_s25 + $0x10] sm:$0xff]  ;;  %v187_v61 = vld [vmem:[%s858_s25] sm:$0xfe] }
  0x1e   : > { %261 = vmatpush.msra.mxu0 %v682_v43  ;;  %706 = vmatmul.msk.f32.vlgmr.msra.gmra.mxu1 %vm247_vm1, %v240_v26  ;;  %v674_v62 = vld [vmem:[%s1186_s1 + $0x140] sm:$0xff]  ;;  %v675_v63 = vld [vmem:[%s1186_s1 + $0x148] sm:$0xff]  ;;  %v157_v1 = vld [vmem:[%s1186_s1 + $0x30] sm:$0xff]  ;;  %v235_v3 = vrot.slane %v187_v61, 1  ;;  %v236_v4 = vrot.slane %v974_v60, 1 }
  0x1f   : > { %356 = vmatpush.msrb.mxu1 %v167_v41  ;;  %398 = vmatpush.msra.mxu3 %v176_v42  ;;  %v984_v0 = vld [vmem:[%s858_s25 + $0x8] sm:$0xff]  ;;  %v166_v2 = vld [vmem:[%s1186_s1 + $0x78] sm:$0xff]  ;;  %v672_v5 = vld [vmem:[%s1186_s1 + $0x130] sm:$0xff] }
  0x20   : > { %307 = vmatpush.msra.mxu2 %v683_v44  ;;  %709 = vmatmul.msk.f32.gmra.mxu3 %vm247_vm1, %v244_v45  ;;  %v673_v6 = vld [vmem:[%s1186_s1 + $0x138] sm:$0xff]  ;;  %v155_v7 = vld [vmem:[%s1186_s1 + $0x20] sm:$0xff]  ;;  %v164_v8 = vld [vmem:[%s1186_s1 + $0x68] sm:$0xff]  ;;  %v237_v11 = vsel %vm234_vm0, %v235_v3, %v236_v4 }
  0x21   : > { %357 = vmatpush.msrb.mxu1 %v165_v46  ;;  %399 = vmatpush.msra.mxu3 %v174_v47  ;;  %v670_v9 = vld [vmem:[%s1186_s1 + $0x120] sm:$0xff]  ;;  %v671_v10 = vld [vmem:[%s1186_s1 + $0x128] sm:$0xff]  ;;  %v153_v12 = vld [vmem:[%s1186_s1 + $0x10] sm:$0xff]  ;;  %v491_v46 = vrot.slane %v864_v19, 2 }
  0x22   : > { %262 = vmatpush.msra.mxu0 %v680_v48  ;;  %308 = vmatpush.msra.mxu2 %v681_v49  ;;  %v162_v13 = vld [vmem:[%s1186_s1 + $0x58] sm:$0xff]  ;;  %v744_v14 = vld [vmem:[%s1186_s1 + $0x330] sm:$0xff]  ;;  %v189_v16 = vld [vmem:[%s858_s25 + $0x20] sm:$0x1] }
  0x23   : > { %358 = vmatpush.msrb.mxu1 %v163_v50  ;;  %400 = vmatpush.msra.mxu3 %v172_v51  ;;  %v745_v15 = vld [vmem:[%s1186_s1 + $0x338] sm:$0xff]  ;;  %v151_v17 = vld [vmem:[%s1186_s1] sm:$0xff]  ;;  %v160_v18 = vld [vmem:[%s1186_s1 + $0x48] sm:$0xff]  ;;  %v241_v23 = vrot.slane %v189_v16, 1 }
  0x24   : > { %263 = vmatpush.msra.mxu0 %v678_v52  ;;  %309 = vmatpush.msra.mxu2 %v679_v53  ;;  %v742_v20 = vld [vmem:[%s1186_s1 + $0x320] sm:$0xff]  ;;  %v748_v22 = vld [vmem:[%s1186_s1 + $0x350] sm:$0xff]  ;;  %v158_v24 = vld [vmem:[%s1186_s1 + $0x38] sm:$0xff] }
  0x25   : > { %359 = vmatpush.msrb.mxu1 %v161_v54  ;;  %401 = vmatpush.msra.mxu3 %v170_v55  ;;  %v147_v21 = vld [vmem:[%s858_s25] sm:$0xff]  ;;  %v740_v25 = vld [vmem:[%s1186_s1 + $0x310] sm:$0xff]  ;;  %v743_v26 = vld [vmem:[%s1186_s1 + $0x328] sm:$0xff]  ;;  %v242_v30 = vsel %vm234_vm0, %v236_v4, %v241_v23  ;;  %v488_v4 = vrot.slane %v974_v60, 2 }
  0x26   : > { %264 = vmatpush.msra.mxu0 %v676_v56  ;;  %310 = vmatpush.msra.mxu2 %v677_v57  ;;  %v746_v27 = vld [vmem:[%s1186_s1 + $0x340] sm:$0xff]  ;;  %v156_v28 = vld [vmem:[%s1186_s1 + $0x28] sm:$0xff]  ;;  %v154_v31 = vld [vmem:[%s1186_s1 + $0x18] sm:$0xff] }
  0x27   : > { %360 = vmatpush.msrb.mxu1 %v159_v58  ;;  %402 = vmatpush.msra.mxu3 %v168_v59  ;;  %v738_v29 = vld [vmem:[%s1186_s1 + $0x300] sm:$0xff]  ;;  %v736_v32 = vld [vmem:[%s1186_s1 + $0x2f0] sm:$0xff]  ;;  %v741_v33 = vld [vmem:[%s1186_s1 + $0x318] sm:$0xff] }
  0x28   : > { %265 = vmatpush.msra.mxu0 %v674_v62  ;;  %707 = vmatmul.msk.f32.gmra.mxu1 %vm247_vm1, %v244_v45  ;;  %v749_v34 = vld [vmem:[%s1186_s1 + $0x358] sm:$0xff]  ;;  %v152_v35 = vld [vmem:[%s1186_s1 + $0x8] sm:$0xff]  ;;  %v734_v36 = vld [vmem:[%s1186_s1 + $0x2e0] sm:$0xff] }
  0x29   : > { %311 = vmatpush.msra.mxu2 %v675_v63  ;;  %710 = vmatmul.msk.f32.vlgmr.msrb.gmra.mxu3 %vm247_vm1, %v984_v0  ;;  %v739_v37 = vld [vmem:[%s1186_s1 + $0x308] sm:$0xff]  ;;  %v732_v38 = vld [vmem:[%s1186_s1 + $0x2d0] sm:$0xff]  ;;  %v737_v40 = vld [vmem:[%s1186_s1 + $0x2f8] sm:$0xff] }
  0x2a   : > { %361 = vmatpush.msrb.mxu1 %v157_v1  ;;  %403 = vmatpush.msra.mxu3 %v166_v2  ;;  %v442_v39 = vld [vmem:[%s858_s25 + $0x8] sm:$0xfc]  ;;  %v186_v41 = vld [vmem:[%s1186_s1 + $0x118] sm:$0xff]  ;;  %v730_v42 = vld [vmem:[%s1186_s1 + $0x2c0] sm:$0xff] }
  0x2b   : > { %266 = vmatpush.msra.mxu0 %v672_v5  ;;  %312 = vmatpush.msra.mxu2 %v673_v6  ;;  %v747_v43 = vld [vmem:[%s1186_s1 + $0x348] sm:$0xff]  ;;  %v490_v45 = vrot.slane %v442_v39, 2  ;;  %v728_v48 = vld [vmem:[%s1186_s1 + $0x2b0] sm:$0xff]  ;;  %v733_v49 = vld [vmem:[%s1186_s1 + $0x2d8] sm:$0xff] }
  0x2c   : > { %362 = vmatpush.msrb.mxu1 %v155_v7  ;;  %404 = vmatpush.msra.mxu3 %v164_v8  ;;  %v735_v44 = vld [vmem:[%s1186_s1 + $0x2e8] sm:$0xff]  ;;  %v726_v50 = vld [vmem:[%s1186_s1 + $0x2a0] sm:$0xff]  ;;  %v724_v53 = vld [vmem:[%s1186_s1 + $0x290] sm:$0xff] }
  0x2d   : > { %267 = vmatpush.msra.mxu0 %v670_v9  ;;  %313 = vmatpush.msra.mxu2 %v671_v10  ;;  %v184_v47 = vld [vmem:[%s1186_s1 + $0x108] sm:$0xff]  ;;  %v492_v52 = vsel %vm486_vm2, %v490_v45, %v491_v46  ;;  %v729_v55 = vld [vmem:[%s1186_s1 + $0x2b8] sm:$0xff]  ;;  %v722_v56 = vld [vmem:[%s1186_s1 + $0x280] sm:$0xff] }
  0x2e   : > { %268 = vmatmul.f32.vlgmr.msra.gmra.mxu0 %v237_v11  ;;  %314 = vmatmul.f32.vlgmr.msra.gmra.mxu2 %v237_v11  ;;  %v731_v51 = vld [vmem:[%s1186_s1 + $0x2c8] sm:$0xff]  ;;  %v720_v59 = vld [vmem:[%s1186_s1 + $0x270] sm:$0xff]  ;;  %v441_v61 = vld [vmem:[%s858_s25] sm:$0xfc] }
  0x2f   : > { %363 = vmatpush.msrb.mxu1 %v153_v12  ;;  %405 = vmatpush.msra.mxu3 %v162_v13  ;;  %v444_v54 = vld [vmem:[%s858_s25 + $0x28] sm:$0x3]  ;;  %v725_v62 = vld [vmem:[%s1186_s1 + $0x298] sm:$0xff]  ;;  %v718_v63 = vld [vmem:[%s1186_s1 + $0x260] sm:$0xff]  ;;  %v487_v3 = vrot.slane %v441_v61, 2 }
  0x30   : > { %503 = vmatpush.msrb.mxu2 %v744_v14  ;;  %549 = vmatpush.msrb.mxu0 %v745_v15  ;;  %v727_v57 = vld [vmem:[%s1186_s1 + $0x2a8] sm:$0xff]  ;;  %v495_v58 = vrot.slane %v444_v54, 2  ;;  %v716_v5 = vld [vmem:[%s1186_s1 + $0x250] sm:$0xff]  ;;  %v721_v6 = vld [vmem:[%s1186_s1 + $0x278] sm:$0xff] }
  0x31   : > { %364 = vmatpush.msrb.mxu1 %v151_v17  ;;  %406 = vmatpush.msra.mxu3 %v160_v18  ;;  %v723_v1 = vld [vmem:[%s1186_s1 + $0x288] sm:$0xff]  ;;  %v714_v7 = vld [vmem:[%s1186_s1 + $0x240] sm:$0xff]  ;;  %v489_v8 = vsel %vm486_vm2, %v487_v3, %v488_v4  ;;  %v717_v10 = vld [vmem:[%s1186_s1 + $0x258] sm:$0xff] }
  0x32   : > { %504 = vmatpush.msrb.mxu2 %v742_v20  ;;  %365 = vmatmul.f32.vlgmr.msrb.gmra.mxu1 %v147_v21  ;;  %v496_v2 = vsel %vm486_vm2, %v491_v46, %v495_v58  ;;  %v443_v9 = vld [vmem:[%s858_s25 + $0x20] sm:$0x3]  ;;  %s667_s25 = sshll.u32 %s795_s10, 1 }
  0x33   : > { %711 = vmatmul.msk.f32.gmra.mxu3 %vm247_vm1, %v864_v19  ;;  %540 = vmatpush.msra.mxu1 %v748_v22  ;;  %v493_v11 = vrot.slane %v443_v9, 2  ;;  %p141_p4 = scmp.lt.s32.totalorder %s667_s25, 3 }
  0x34   : > { %407 = vmatpush.msra.mxu3 %v158_v24  ;;  %505 = vmatpush.msrb.mxu2 %v740_v25 }
  0x35   : > { %550 = vmatpush.msrb.mxu0 %v743_v26  ;;  %541 = vmatpush.msra.mxu1 %v746_v27  ;;  %v494_v12 = vsel %vm486_vm2, %v488_v4, %v493_v11  ;;  %s1189_s25 = smov (!%p141_p4, %s667_s25), 3 }
  0x36   : > { %408 = vmatpush.msra.mxu3 %v156_v28  ;;  %506 = vmatpush.msrb.mxu2 %v738_v29  ;;  %s756_s3 = sshll.u32 %s1189_s25, 4 }
  0x37   : > { %271 = vmatmul.f32.gmra.mxu0 %v242_v30  ;;  %317 = vmatmul.f32.gmra.mxu2 %v242_v30  ;;  %s145_s5 = scalar_lea.vmem %s1187_s2, %s756_s3 }
  0x38   : > { %409 = vmatpush.msra.mxu3 %v154_v31  ;;  %507 = vmatpush.msrb.mxu2 %v736_v32 }
  0x39   : > { %551 = vmatpush.msrb.mxu0 %v741_v33  ;;  %586 = vmatpush.msrb.mxu1 %v749_v34 }
  0x3a   : > { %410 = vmatpush.msra.mxu3 %v152_v35  ;;  %508 = vmatpush.msrb.mxu2 %v734_v36 }
  0x3b   : > { %552 = vmatpush.msrb.mxu0 %v739_v37  ;;  %368 = vmatmul.f32.gmra.mxu1 %v974_v60 }
  0x3c   : > { %411 = vmatmul.f32.vlgmr.msra.gmra.mxu3 %v147_v21  ;;  %509 = vmatpush.msrb.mxu2 %v732_v38 }
  0x3d   : > { %553 = vmatpush.msrb.mxu0 %v737_v40  ;;  %432 = vmatpush.msrb.mxu3 %v186_v41 }
  0x3e   : > { %510 = vmatpush.msrb.mxu2 %v730_v42  ;;  %587 = vmatpush.msrb.mxu1 %v747_v43 }
  0x3f   : > { %554 = vmatpush.msrb.mxu0 %v735_v44  ;;  %433 = vmatpush.msrb.mxu3 %v184_v47 }
  0x40   : > { %511 = vmatpush.msrb.mxu2 %v728_v48 }
  0x41   : > { %555 = vmatpush.msrb.mxu0 %v733_v49 }
  0x42   : > { %512 = vmatpush.msrb.mxu2 %v726_v50 }
  0x43   : > { %556 = vmatpush.msrb.mxu0 %v731_v51  ;;  %750 = vmatmul.msk.f32.vlgmr.msra.gmra.mxu1 %vm247_vm1, %v492_v52 }
  0x44   : > { %414 = vmatmul.f32.gmra.mxu3 %v974_v60  ;;  %513 = vmatpush.msrb.mxu2 %v724_v53  ;;  %v719_v60 = vld [vmem:[%s1186_s1 + $0x268] sm:$0xff] }
  0x45   : > { %557 = vmatpush.msrb.mxu0 %v729_v55 }
  0x46   : > { %514 = vmatpush.msrb.mxu2 %v722_v56 }
  0x47   : > { %558 = vmatpush.msrb.mxu0 %v727_v57 }
  0x48   : > { %515 = vmatpush.msrb.mxu2 %v720_v59 }
  0x49   : > { %559 = vmatpush.msrb.mxu0 %v725_v62 }
  0x4a   : > { %516 = vmatpush.msrb.mxu2 %v718_v63 }
  0x4b   : > { %560 = vmatpush.msrb.mxu0 %v723_v1  ;;  %751 = vmatmul.msk.f32.gmra.mxu1 %vm247_vm1, %v496_v2 }
  0x4c   : > { %712 = vmatmul.msk.f32.vlgmr.msrb.gmra.mxu3 %vm247_vm1, %v984_v0  ;;  %517 = vmatpush.msrb.mxu2 %v716_v5  ;;  %v715_v0 = vld [vmem:[%s1186_s1 + $0x248] sm:$0xff] }
  0x4d   : > { %561 = vmatpush.msrb.mxu0 %v721_v6 }
  0x4e   : > { %518 = vmatpush.msrb.mxu2 %v714_v7 }
  0x4f   : > { %562 = vmatpush.msrb.mxu0 %v719_v60  ;;  %519 = vmatmul.f32.vlgmr.msrb.gmra.mxu2 %v489_v8 }
  0x51   : > { %563 = vmatpush.msrb.mxu0 %v717_v10 }
  0x53   : > { %564 = vmatpush.msrb.mxu0 %v715_v0  ;;  %752 = vmatmul.msk.f32.vlgmr.msrb.gmra.mxu1 %vm247_vm1, %v492_v52 }
  0x54   : > { %713 = vmatmul.msk.f32.gmra.mxu3 %vm247_vm1, %v864_v19  ;;  %565 = vmatmul.f32.vlgmr.msrb.gmra.mxu0 %v489_v8 }
  0x57   : > { %522 = vmatmul.f32.gmra.mxu2 %v494_v12 }
  0x5b   : > { %753 = vmatmul.msk.f32.gmra.mxu1 %vm247_vm1, %v496_v2 }
  0x5c   : > { %568 = vmatmul.f32.gmra.mxu0 %v494_v12 }
  0x98   : > { %v338_v13 = vpop.f32.mrf.mxu3 }
  0x9b   : > { %v292_v14 = vpop.f32.mrf.mxu1 }
  0xa3   : > { %v341_v15 = vpop.f32.mrf.mxu3 }
  0xa5   : > { %v295_v16 = vpop.f32.mrf.mxu1 }
  0xab   : > { %v269_v22 = vpop.f32.mrf.mxu0 }
  0xac   : > { %v389_v17 = vpop.f32.mrf.mxu3  ;;  %v293_v29 = vadd.f32 %v292_v14, %v269_v22 }
  0xaf   : > { %v366_v18 = vpop.f32.mrf.mxu1 }
  0xb0   : > { %v367_v31 = vadd.f32 %v366_v18, %v293_v29 }
  0xb1   : > { %v315_v24 = vpop.f32.mrf.mxu2 }
  0xb2   : > { %v339_v30 = vadd.f32 %v338_v13, %v315_v24  ;;  %v390_v39 = vadd.f32 %v389_v17, %v367_v31 }
  0xb4   : > { %v272_v27 = vpop.f32.mrf.mxu0 }
  0xb5   : > { %v296_v40 = vadd.f32 %v295_v16, %v272_v27 }
  0xb6   : > { %v392_v20 = vpop.f32.mrf.mxu3 }
  0xb8   : > { %v369_v21 = vpop.f32.mrf.mxu1 }
  0xb9   : > { %v370_v45 = vadd.f32 %v369_v21, %v296_v40 }
  0xba   : > { %v318_v28 = vpop.f32.mrf.mxu2 }
  0xbb   : > { %v342_v44 = vadd.f32 %v341_v15, %v318_v28  ;;  %v393_v53 = vadd.f32 %v392_v20, %v370_v45 }
  0xbf   : > { %v412_v23 = vpop.f32.mrf.mxu3 }
  0xc0   : > { %v543_v19 = vpop.f32.mrf.mxu1  ;;  %v413_v33 = vadd.f32 %v412_v23, %v339_v30 }
  0xc7   : > { %v415_v25 = vpop.f32.mrf.mxu3 }
  0xc8   : > { %v546_v26 = vpop.f32.mrf.mxu1  ;;  %v416_v47 = vadd.f32 %v415_v25, %v342_v44 }
  0xcf   : > { %v435_v32 = vpop.f32.mrf.mxu3 }
  0xd0   : > { %v589_v34 = vpop.f32.mrf.mxu1  ;;  %v436_v36 = vadd.f32 %v435_v32, %v413_v33 }
  0xd1   : > { %v566_v35 = vpop.f32.mrf.mxu0 }
  0xd2   : > { %v590_v37 = vadd.f32 %v589_v34, %v566_v35  ;;  %v520_v38 = vpop.f32.mrf.mxu2 }
  0xd3   : > { %v544_v41 = vadd.f32 %v543_v19, %v520_v38 }
  0xd4   : > { %v596_v42 = vadd.f32 %v590_v37, %v436_v36 }
  0xd5   : > { %v595_v43 = vadd.f32 %v544_v41, %v390_v39 }
  0xd6   : > { %600 = vst [vmem:[%s145_s5 + $0x8] sm:$0xff] %v596_v42 }
  0xd7   : > { %599 = vst [vmem:[%s145_s5] sm:$0xff] %v595_v43  ;;  %v438_v46 = vpop.f32.mrf.mxu3 }
  0xd8   : > { %v592_v48 = vpop.f32.mrf.mxu1  ;;  %v439_v50 = vadd.f32 %v438_v46, %v416_v47 }
  0xd9   : > { %v569_v49 = vpop.f32.mrf.mxu0 }
  0xda   : > { %v593_v51 = vadd.f32 %v592_v48, %v569_v49  ;;  %v523_v52 = vpop.f32.mrf.mxu2 }
  0xdb   : > { %v547_v54 = vadd.f32 %v546_v26, %v523_v52 }
  0xdc   : > { %v598_v55 = vadd.f32 %v593_v51, %v439_v50 }
  0xdd   : > { %v597_v56 = vadd.f32 %v547_v54, %v393_v53 }
  0xde   : > { %602 = vst [vmem:[%s145_s5 + $0x18] sm:$0xff] %v598_v55 }
  0xdf   : > { %601 = vst [vmem:[%s145_s5 + $0x10] sm:$0xff] %v597_v56 }
  0xe0 PF: > { %s12_s9 = sadd.s32 1, %s772_s9  }
  0xe1   : > { %p9_p5 = scmp.ge.s32.totalorder %s12_s9, 4  }
  0xe3   :  { %11 = sbr.rel (!%p9_p5) target bundleno = 1 (0x1), region = 60 }

</bundles_post_ra>
